<compile_context>
chip_gen: v7x
topology: tpu7x:2x2x1
jax: 0.10.0
libtpu: 0.0.40
codegen_flags: <defaults>
</compile_context>

<pallas_src>
import jax
import jax.numpy as jnp
from jax.experimental import pallas as pl
from jax.experimental.pallas import tpu as pltpu


def _round_up(x, m):
    return (x + m - 1) // m * m


def _decoder_kernel(z_ref, w1_ref, b1_ref, w2_ref, b2_ref, w3_ref, b3_ref, logits_ref):
    # z_ref: (TILE_B, M_pad) bf16; weights bf16; biases f32; output f32.
    z = z_ref[...]

    h1 = jnp.dot(z, w1_ref[...], preferred_element_type=jnp.float32) + b1_ref[...]
    h1 = jnp.maximum(h1, 0.0)                                   # ReLU in f32 (VPU)

    h2 = jnp.dot(h1.astype(w2_ref.dtype), w2_ref[...],
                 preferred_element_type=jnp.float32) + b2_ref[...]
    h2 = jnp.maximum(h2, 0.0)

    y = jnp.dot(h2.astype(w3_ref.dtype), w3_ref[...],
                preferred_element_type=jnp.float32) + b3_ref[...]

    logits_ref[...] = y                                          # lane-dense, unmasked store


def bernoulli_decoder_logits(z, params, out_hw):
    """Forward pass of BernoulliDecoder's decoder_net. Returns Bernoulli logits (B, F1, F2).

    z: (B, M) latents. params: (w1, b1, w2, b2, w3, b3), weights stored as
    (in_features, out_features) so the kernel computes z @ W + b.
    """
    w1, b1, w2, b2, w3, b3 = params
    B, M = z.shape
    F1, F2 = out_hw
    D_out = F1 * F2
    H = w1.shape[1]
    assert w3.shape[1] == D_out

    LANE = 128
    M_pad = _round_up(M, LANE)
    H_pad = _round_up(H, LANE)
    D_pad = _round_up(D_out, LANE)

    # MXU-aligned batch tile for real batches; sublane-aligned for tiny demo batches.
    TILE_B = 128 if B >= 128 else _round_up(B, 8)
    B_pad = _round_up(B, TILE_B)
    grid = (B_pad // TILE_B,)

    bf16 = jnp.bfloat16
    f32 = jnp.float32

    # Zero-pad to lane-dense shapes (numerically exact) and cast matmul operands to bf16.
    zp = jnp.zeros((B_pad, M_pad), bf16).at[:B, :M].set(z.astype(bf16))
    w1p = jnp.zeros((M_pad, H_pad), bf16).at[:M, :H].set(w1.astype(bf16))
    b1p = jnp.zeros((1, H_pad), f32).at[:, :H].set(b1.astype(f32))
    w2p = jnp.zeros((H_pad, H_pad), bf16).at[:H, :H].set(w2.astype(bf16))
    b2p = jnp.zeros((1, H_pad), f32).at[:, :H].set(b2.astype(f32))
    w3p = jnp.zeros((H_pad, D_pad), bf16).at[:H, :D_out].set(w3.astype(bf16))
    b3p = jnp.zeros((1, D_pad), f32).at[:, :D_out].set(b3.astype(f32))

    resident = lambda shape: pl.BlockSpec(shape, lambda i: (0, 0))  # same block every step

    out = pl.pallas_call(
        _decoder_kernel,
        out_shape=jax.ShapeDtypeStruct((B_pad, D_pad), f32),
        grid=grid,
        in_specs=[
            pl.BlockSpec((TILE_B, M_pad), lambda i: (i, 0)),   # z tile (pipelined)
            resident((M_pad, H_pad)), resident((1, H_pad)),    # w1, b1 (VMEM-resident)
            resident((H_pad, H_pad)), resident((1, H_pad)),    # w2, b2
            resident((H_pad, D_pad)), resident((1, D_pad)),    # w3, b3
        ],
        out_specs=pl.BlockSpec((TILE_B, D_pad), lambda i: (i, 0)),
        compiler_params=pltpu.CompilerParams(
            dimension_semantics=("parallel",),
        ),
    )(zp, w1p, b1p, w2p, b2p, w3p, b3p)

    logits = out[:B, :D_out].reshape(B, F1, F2)
    # TODO(synk): td.Independent(td.Bernoulli(logits=logits), 2) distribution object (and the
    # unused self.std nn.Parameter) have no Pallas equivalent; we return the logits tensor.
    return logits


def init_params(key, m, hidden, d_out):
    """Mimic torch.nn.Linear default init: U[-1/sqrt(fan_in), 1/sqrt(fan_in)]."""
    ks = jax.random.split(key, 6)

    def lin(kw, kb, fan_in, fan_out):
        bound = 1.0 / jnp.sqrt(float(fan_in))
        w = jax.random.uniform(kw, (fan_in, fan_out), jnp.float32, -bound, bound)
        b = jax.random.uniform(kb, (1, fan_out), jnp.float32, -bound, bound)
        return w, b

    w1, b1 = lin(ks[0], ks[1], m, hidden)
    w2, b2 = lin(ks[2], ks[3], hidden, hidden)
    w3, b3 = lin(ks[4], ks[5], hidden, d_out)
    return (w1, b1, w2, b2, w3, b3)


if __name__ == "__main__":
    # Small shapes consistent with the module: z is (batch, M); decoder outputs (batch, F1, F2).
    B, M = 2, 8
    HIDDEN = 32
    F1, F2 = 16, 16

    key = jax.random.PRNGKey(0)
    kz, kp = jax.random.split(key)

    z = jax.random.normal(kz, (B, M), dtype=jnp.float32)
    params = init_params(kp, M, HIDDEN, F1 * F2)

    logits = bernoulli_decoder_logits(z, params, (F1, F2))
    jax.block_until_ready(logits)

    # Reference: same math (bf16 matmul operands, f32 accumulation / bias / ReLU), pure JAX.
    w1, b1, w2, b2, w3, b3 = params
    bf16 = jnp.bfloat16
    zb = z.astype(bf16)
    h1 = jnp.maximum(jnp.dot(zb, w1.astype(bf16), preferred_element_type=jnp.float32) + b1, 0.0)
    h2 = jnp.maximum(jnp.dot(h1.astype(bf16), w2.astype(bf16),
                             preferred_element_type=jnp.float32) + b2, 0.0)
    y = jnp.dot(h2.astype(bf16), w3.astype(bf16), preferred_element_type=jnp.float32) + b3
    ref_logits = y.reshape(B, F1, F2)

    assert logits.shape == (B, F1, F2)
    assert logits.dtype == jnp.float32
    assert jnp.allclose(logits, ref_logits, atol=1e-3, rtol=1e-3)
    assert bool(jnp.all(jnp.isfinite(logits)))

    print("KERNEL_OK")
</pallas_src>

<mosaic_0001>
module attributes {stable_mosaic.version = 11 : i64} {
  func.func @_decoder_kernel(%arg0: i32, %arg1: memref<8x128xbf16, #tpu.memory_space<vmem>>, %arg2: memref<128x128xbf16, #tpu.memory_space<vmem>>, %arg3: memref<1x128xf32, #tpu.memory_space<vmem>>, %arg4: memref<128x128xbf16, #tpu.memory_space<vmem>>, %arg5: memref<1x128xf32, #tpu.memory_space<vmem>>, %arg6: memref<128x256xbf16, #tpu.memory_space<vmem>>, %arg7: memref<1x256xf32, #tpu.memory_space<vmem>>, %arg8: memref<8x256xf32, #tpu.memory_space<vmem>>) attributes {dimension_semantics = [#tpu.dimension_semantics<parallel>], iteration_bounds = array<i64: 1>, scalar_prefetch = 0 : i64, scratch_operands = 0 : i64, tpu.core_type = #tpu.core_type<tc>, window_params = [{transform_indices = @transform_0, window_bounds = array<i64: 8, 128>}, {pipeline_mode = #tpu.pipeline_mode<synchronous>, transform_indices = @transform_1, window_bounds = array<i64: 128, 128>}, {pipeline_mode = #tpu.pipeline_mode<synchronous>, transform_indices = @transform_2, window_bounds = array<i64: 1, 128>}, {pipeline_mode = #tpu.pipeline_mode<synchronous>, transform_indices = @transform_3, window_bounds = array<i64: 128, 128>}, {pipeline_mode = #tpu.pipeline_mode<synchronous>, transform_indices = @transform_4, window_bounds = array<i64: 1, 128>}, {pipeline_mode = #tpu.pipeline_mode<synchronous>, transform_indices = @transform_5, window_bounds = array<i64: 128, 256>}, {pipeline_mode = #tpu.pipeline_mode<synchronous>, transform_indices = @transform_6, window_bounds = array<i64: 1, 256>}, {transform_indices = @transform_7, window_bounds = array<i64: 8, 256>}]} {
    %c0 = arith.constant 0 : index
    %c0_0 = arith.constant 0 : index
    %0 = vector.load %arg1[%c0, %c0_0] : memref<8x128xbf16, #tpu.memory_space<vmem>>, vector<8x128xbf16>
    %c0_1 = arith.constant 0 : index
    %c0_2 = arith.constant 0 : index
    %1 = vector.load %arg2[%c0_1, %c0_2] : memref<128x128xbf16, #tpu.memory_space<vmem>>, vector<128x128xbf16>
    %cst = arith.constant dense<0.000000e+00> : vector<8x128xf32>
    %2 = tpu.matmul %0, %1, %cst {dimension_numbers = #tpu.dot_dimension_numbers<[1], [0], [0], [1], [0, 0, 1, 1], [], []>} : vector<8x128xbf16>, vector<128x128xbf16>, vector<8x128xf32> -> vector<8x128xf32>
    %c0_3 = arith.constant 0 : index
    %c0_4 = arith.constant 0 : index
    %3 = vector.load %arg3[%c0_3, %c0_4] : memref<1x128xf32, #tpu.memory_space<vmem>>, vector<1x128xf32>
    %4 = vector.broadcast %3 : vector<1x128xf32> to vector<8x128xf32>
    %5 = arith.addf %2, %4 : vector<8x128xf32>
    %cst_5 = arith.constant 0.000000e+00 : f32
    %6 = vector.broadcast %cst_5 : f32 to vector<8x128xf32>
    %7 = arith.maximumf %5, %6 : vector<8x128xf32>
    %8 = arith.truncf %7 : vector<8x128xf32> to vector<8x128xbf16>
    %c0_6 = arith.constant 0 : index
    %c0_7 = arith.constant 0 : index
    %9 = vector.load %arg4[%c0_6, %c0_7] : memref<128x128xbf16, #tpu.memory_space<vmem>>, vector<128x128xbf16>
    %cst_8 = arith.constant dense<0.000000e+00> : vector<8x128xf32>
    %10 = tpu.matmul %8, %9, %cst_8 {dimension_numbers = #tpu.dot_dimension_numbers<[1], [0], [0], [1], [0, 0, 1, 1], [], []>} : vector<8x128xbf16>, vector<128x128xbf16>, vector<8x128xf32> -> vector<8x128xf32>
    %c0_9 = arith.constant 0 : index
    %c0_10 = arith.constant 0 : index
    %11 = vector.load %arg5[%c0_9, %c0_10] : memref<1x128xf32, #tpu.memory_space<vmem>>, vector<1x128xf32>
    %12 = vector.broadcast %11 : vector<1x128xf32> to vector<8x128xf32>
    %13 = arith.addf %10, %12 : vector<8x128xf32>
    %cst_11 = arith.constant 0.000000e+00 : f32
    %14 = vector.broadcast %cst_11 : f32 to vector<8x128xf32>
    %15 = arith.maximumf %13, %14 : vector<8x128xf32>
    %16 = arith.truncf %15 : vector<8x128xf32> to vector<8x128xbf16>
    %c0_12 = arith.constant 0 : index
    %c0_13 = arith.constant 0 : index
    %17 = vector.load %arg6[%c0_12, %c0_13] : memref<128x256xbf16, #tpu.memory_space<vmem>>, vector<128x256xbf16>
    %cst_14 = arith.constant dense<0.000000e+00> : vector<8x256xf32>
    %18 = tpu.matmul %16, %17, %cst_14 {dimension_numbers = #tpu.dot_dimension_numbers<[1], [0], [0], [1], [0, 0, 1, 1], [], []>} : vector<8x128xbf16>, vector<128x256xbf16>, vector<8x256xf32> -> vector<8x256xf32>
    %c0_15 = arith.constant 0 : index
    %c0_16 = arith.constant 0 : index
    %19 = vector.load %arg7[%c0_15, %c0_16] : memref<1x256xf32, #tpu.memory_space<vmem>>, vector<1x256xf32>
    %20 = vector.broadcast %19 : vector<1x256xf32> to vector<8x256xf32>
    %21 = arith.addf %18, %20 : vector<8x256xf32>
    %c0_17 = arith.constant 0 : index
    %c0_18 = arith.constant 0 : index
    %22 = vector.load %arg8[%c0_17, %c0_18] : memref<8x256xf32, #tpu.memory_space<vmem>>, vector<8x256xf32>
    tpu.vector_store %arg8[%c0_17, %c0_18], %21 {strides = array<i32>} : memref<8x256xf32, #tpu.memory_space<vmem>>, vector<8x256xf32>,
    return
  }
  func.func @transform_0(%arg0: i32) -> (i32, i32) {
    %c0_i32 = arith.constant 0 : i32
    %c0_i32_0 = arith.constant 0 : i32
    return %arg0, %c0_i32 : i32, i32
  }
  func.func @transform_1(%arg0: i32) -> (i32, i32) {
    %c0_i32 = arith.constant 0 : i32
    %c0_i32_0 = arith.constant 0 : i32
    %c0_i32_1 = arith.constant 0 : i32
    return %c0_i32, %c0_i32_0 : i32, i32
  }
  func.func @transform_2(%arg0: i32) -> (i32, i32) {
    %c0_i32 = arith.constant 0 : i32
    %c0_i32_0 = arith.constant 0 : i32
    %c0_i32_1 = arith.constant 0 : i32
    return %c0_i32, %c0_i32_0 : i32, i32
  }
  func.func @transform_3(%arg0: i32) -> (i32, i32) {
    %c0_i32 = arith.constant 0 : i32
    %c0_i32_0 = arith.constant 0 : i32
    %c0_i32_1 = arith.constant 0 : i32
    return %c0_i32, %c0_i32_0 : i32, i32
  }
  func.func @transform_4(%arg0: i32) -> (i32, i32) {
    %c0_i32 = arith.constant 0 : i32
    %c0_i32_0 = arith.constant 0 : i32
    %c0_i32_1 = arith.constant 0 : i32
    return %c0_i32, %c0_i32_0 : i32, i32
  }
  func.func @transform_5(%arg0: i32) -> (i32, i32) {
    %c0_i32 = arith.constant 0 : i32
    %c0_i32_0 = arith.constant 0 : i32
    %c0_i32_1 = arith.constant 0 : i32
    return %c0_i32, %c0_i32_0 : i32, i32
  }
  func.func @transform_6(%arg0: i32) -> (i32, i32) {
    %c0_i32 = arith.constant 0 : i32
    %c0_i32_0 = arith.constant 0 : i32
    %c0_i32_1 = arith.constant 0 : i32
    return %c0_i32, %c0_i32_0 : i32, i32
  }
  func.func @transform_7(%arg0: i32) -> (i32, i32) {
    %c0_i32 = arith.constant 0 : i32
    %c0_i32_0 = arith.constant 0 : i32
    return %arg0, %c0_i32 : i32, i32
  }
}

</mosaic_0001>

<bundles_post_ra>
// kernel: tpu_custom_call.1
= control target key start
LH: loop header
LB: loop body
LE: loop exit
PB: predicated region body
PF: predicated region fallthrough
CT: control target
= control target key end

     0   :  { %12 = vsyncpa [#allocation3], 0  ;;  %s865_s0 = inlined_call_operand.hbm [shape: bf16[8,128], index: 0, kind: input, shape index: {}]   ;;  %s866_s1 = inlined_call_operand.hbm [shape: bf16[128,128], index: 1, kind: input, shape index: {}]   ;;  %s867_s2 = inlined_call_operand.vmem [shape: f32[1,128], index: 2, kind: input, shape index: {}]   ;;  %s868_s3 = inlined_call_operand.hbm [shape: bf16[128,128], index: 3, kind: input, shape index: {}]   ;;  %s869_s4 = inlined_call_operand.vmem [shape: f32[1,128], index: 4, kind: input, shape index: {}]   ;;  %s870_s5 = inlined_call_operand.hbm [shape: bf16[128,256], index: 5, kind: input, shape index: {}]   ;;  %s871_s6 = inlined_call_operand.vmem [shape: f32[1,256], index: 6, kind: input, shape index: {}]   ;;  %s872_s7 = inlined_call_operand.hbm [shape: f32[8,256], index: 7, kind: output, shape index: {}]  }
   0x1   :  { %13 = vsyncpa [#allocation6], 0 }
   0x2   :  { %14 = vsyncpa [#allocation9], 0 }
   0x3   :  { %15 = vsyncpa [#allocation4], 0  ;;  %s738_s24 = smov [#allocation5]   ;;  %s620_s28 = scalar_lea.hbm %s866_s1, 1024 }
   0x4   :  { %s31_s25 = sshll.u32 %s738_s24, 4  ;;  %p621_p0 = scmp.ne.s32.totalorder %s866_s1, %s620_s28  ;;  %s32_s25 = int_to_ptr.vmem [resolvable:$true] %s31_s25 }
   0x5   :  { %p624_p1 = scmp.lt.u32.totalorder %s620_s28, %s866_s1 }
   0x7   :  { %p626_p2 = pnand %p624_p1, %p621_p0 }
   0x9   :  { %629 = shalt.err (!%p626_p2)
}
   0xa   :  { %s630_s10 = scalar_lea.vmem %s32_s25, 1024  ;;  %p635_p4 = scmp.lt.s32.totalorder %s32_s25, %s32_s25 }
   0xb   :  { %p631_p3 = scmp.ne.s32.totalorder %s32_s25, %s630_s10  ;;  %p636_p5 = scmp.lt.s32.totalorder %s630_s10, %s630_s10 }
   0xd   :  { %p637_p6 = por %p636_p5, %p635_p4 }
   0xf   :  { %p638_p7 = pnand %p637_p6, %p631_p3 }
  0x11   :  { %641 = shalt.err (!%p638_p7)
}
  0x12   :  { %s739_s11 = smov 64   ;;  %s740_s12 = smov 4  }
  0x13   :  { %37 = dma.hbm_to_vmem [thread:$0]  %s866_s1, 1024, %s32_s25, [#allocation6], %s739_s11, %s739_s11, %s740_s12  }
  0x14   :  { %s741_s15 = smov [#allocation2]   ;;  %s742_s17 = smov [#allocation7]  }
  0x15   :  { %s22_s16 = sshll.u32 %s741_s15, 4  ;;  %s45_s18 = sshll.u32 %s742_s17, 4  ;;  %s23_s16 = int_to_ptr.vmem [resolvable:$true] %s22_s16  ;;  %s46_s18 = int_to_ptr.vmem [resolvable:$true] %s45_s18 }
  0x16   :  { %s642_s21 = scalar_lea.hbm %s865_s0, 64 }
  0x17   :  { %p643_p8 = scmp.ne.s32.totalorder %s865_s0, %s642_s21  ;;  %p646_p9 = scmp.lt.u32.totalorder %s642_s21, %s865_s0 }
  0x19   :  { %p648_p10 = pnand %p646_p9, %p643_p8 }
  0x1b   :  { %651 = shalt.err (!%p648_p10)
}
  0x1c   :  { %s652_s1 = scalar_lea.vmem %s23_s16, 64  ;;  %p657_p12 = scmp.lt.s32.totalorder %s23_s16, %s23_s16 }
  0x1d   :  { %p653_p11 = scmp.ne.s32.totalorder %s23_s16, %s652_s1  ;;  %p658_p13 = scmp.lt.s32.totalorder %s652_s1, %s652_s1 }
  0x1f   :  { %p659_p0 = por %p658_p13, %p657_p12 }
  0x21   :  { %p660_p1 = pnand %p659_p0, %p653_p11 }
  0x23   :  { %663 = shalt.err (!%p660_p1)
}
  0x24   :  { %25 = dma.hbm_to_vmem [thread:$0]  %s865_s0, 64, %s23_s16, [#allocation3]  }
  0x25   :  { %s664_s30 = scalar_lea.hbm %s868_s3, 1024 }
  0x26   :  { %p665_p2 = scmp.ne.s32.totalorder %s868_s3, %s664_s30  ;;  %p668_p3 = scmp.lt.u32.totalorder %s664_s30, %s868_s3 }
  0x28   :  { %p670_p4 = pnand %p668_p3, %p665_p2 }
  0x2a   :  { %673 = shalt.err (!%p670_p4)
}
  0x2b   :  { %s674_s14 = scalar_lea.vmem %s46_s18, 1024  ;;  %p679_p6 = scmp.lt.s32.totalorder %s46_s18, %s46_s18 }
  0x2c   :  { %p675_p5 = scmp.ne.s32.totalorder %s46_s18, %s674_s14  ;;  %p680_p7 = scmp.lt.s32.totalorder %s674_s14, %s674_s14 }
  0x2e   :  { %p681_p8 = por %p680_p7, %p679_p6 }
  0x30   :  { %p682_p9 = pnand %p681_p8, %p675_p5 }
  0x32   :  { %685 = shalt.err (!%p682_p9)
}
  0x33   :  { %51 = dma.hbm_to_vmem [thread:$0]  %s868_s3, 1024, %s46_s18, [#allocation6], %s739_s11, %s739_s11, %s740_s12  }
  0x34   :  { %s743_s16 = smov [#allocation8]   ;;  %s686_s21 = scalar_lea.hbm %s870_s5, 2048 }
  0x35   :  { %s59_s17 = sshll.u32 %s743_s16, 4  ;;  %p687_p10 = scmp.ne.s32.totalorder %s870_s5, %s686_s21  ;;  %s60_s17 = int_to_ptr.vmem [resolvable:$true] %s59_s17 }
  0x36   :  { %p690_p11 = scmp.lt.u32.totalorder %s686_s21, %s870_s5 }
  0x38   :  { %p692_p12 = pnand %p690_p11, %p687_p10 }
  0x3a   :  { %695 = shalt.err (!%p692_p12)
}
  0x3b   :  { %s696_s1 = scalar_lea.vmem %s60_s17, 2048  ;;  %p701_p0 = scmp.lt.s32.totalorder %s60_s17, %s60_s17 }
  0x3c   :  { %p697_p13 = scmp.ne.s32.totalorder %s60_s17, %s696_s1  ;;  %p702_p1 = scmp.lt.s32.totalorder %s696_s1, %s696_s1 }
  0x3e   :  { %p703_p2 = por %p702_p1, %p701_p0 }
  0x40   :  { %p704_p3 = pnand %p703_p2, %p697_p13 }
  0x42   :  { %707 = shalt.err (!%p704_p3)
}
  0x43   :  { %s744_s3 = smov 128   ;;  %s745_s11 = smov 8  }
  0x44   :  { %65 = dma.hbm_to_vmem [thread:$0]  %s870_s5, 2048, %s60_s17, [#allocation9], %s744_s3, %s744_s3, %s745_s11  }
  0x45   :  { %730 = dma.done.wait [#allocation3], 64  }
  0x46   :  { %731 = vsyncadd [#allocation3], 4294967232 }
  0x47   :  { %732 = dma.done.wait [#allocation6], 2048  }
  0x48   :  { %733 = vsyncadd [#allocation6], 4294965248 }
  0x49   :  { %734 = dma.done.wait [#allocation9], 2048  }
  0x4a   :  { %735 = vsyncadd [#allocation9], 4294965248  ;;  %v746_v0 = vmov 0.0   ;;  %vm747_vm0 = vmmov 0   ;;  %v580_v1 = vld [vmem:[#allocation5] sm:$0xff]   ;;  %v581_v2 = vld [vmem:[#allocation5 + $0x8] sm:$0xff]   ;;  %v326_v51 = vlaneseq }
  0x4b   :  { %528 = vmatprep.subr.bf16.mxu0 %v746_v0  ;;  %544 = vmatprep.mubr.msk.bf16.mxu0 %vm747_vm0, %v746_v0  ;;  %v582_v3 = vld [vmem:[#allocation5 + $0x10] sm:$0xff]   ;;  %v588_v4 = vld [vmem:[#allocation7] sm:$0xff]   ;;  %v583_v5 = vld [vmem:[#allocation5 + $0x18] sm:$0xff]   ;;  %v748_v42 = vmov 0   ;;  %s749_s30 = smov [#allocation10]  }
  0x4c   :  { %548 = vmatprep.subr.bf16.mxu1 %v746_v0  ;;  %564 = vmatprep.mubr.msk.bf16.mxu1 %vm747_vm0, %v746_v0  ;;  %v589_v6 = vld [vmem:[#allocation7 + $0x8] sm:$0xff]   ;;  %v584_v7 = vld [vmem:[#allocation5 + $0x20] sm:$0xff]   ;;  %v590_v8 = vld [vmem:[#allocation7 + $0x10] sm:$0xff]   ;;  %v327_v52 = vshrl.u32 %v326_v51, 7 }
  0x4d   :  { %529 = vmatpush3.bf16.msra.mxu0 %v580_v1  ;;  %549 = vmatpush3.bf16.msra.mxu1 %v588_v4  ;;  %v585_v9 = vld [vmem:[#allocation5 + $0x28] sm:$0xff]   ;;  %v591_v10 = vld [vmem:[#allocation7 + $0x18] sm:$0xff]   ;;  %v586_v11 = vld [vmem:[#allocation5 + $0x30] sm:$0xff]  }
  0x4e   :  { %530 = vmatprep.subr.bf16.mxu0 %v746_v0  ;;  %550 = vmatprep.subr.bf16.mxu1 %v746_v0  ;;  %v592_v12 = vld [vmem:[#allocation7 + $0x20] sm:$0xff]   ;;  %v587_v13 = vld [vmem:[#allocation5 + $0x38] sm:$0xff]   ;;  %v593_v14 = vld [vmem:[#allocation7 + $0x28] sm:$0xff]   ;;  %v328_v53 = vsub.s32 0, %v327_v52  ;;  %v332_v55 = vsub.s32 1, %v327_v52 }
  0x4f   :  { %v81_v15 = vld [vmem:[#allocation2] sm:$0xf]  ;;  %v594_v16 = vld [vmem:[#allocation7 + $0x30] sm:$0xff]   ;;  %v596_v18 = vld [vmem:[#allocation8] ss:$8 sps:$4 sm:$0xff]  }
  0x50   :  { %v595_v17 = vld [vmem:[#allocation7 + $0x38] sm:$0xff]   ;;  %v598_v19 = vld [vmem:[#allocation8 + $0x4] ss:$8 sps:$4 sm:$0xff]   ;;  %v602_v23 = vld [vmem:[#allocation8 + $0x20] ss:$8 sps:$4 sm:$0xff]  }
  0x51   :  { %531 = vmatpush3.bf16.msra.mxu0 %v581_v2  ;;  %551 = vmatpush3.bf16.msra.mxu1 %v589_v6  ;;  %v601_v20 = vld [vmem:[#allocation8 + $0x14] ss:$8 sps:$4 sm:$0xff]   ;;  %v599_v21 = vld [vmem:[#allocation8 + $0x10] ss:$8 sps:$4 sm:$0xff]   ;;  %v604_v22 = vld [vmem:[#allocation8 + $0x24] ss:$8 sps:$4 sm:$0xff]  }
  0x52   :  { %532 = vmatprep.subr.bf16.mxu0 %v746_v0  ;;  %552 = vmatprep.subr.bf16.mxu1 %v746_v0  ;;  %v607_v24 = vld [vmem:[#allocation8 + $0x34] ss:$8 sps:$4 sm:$0xff]   ;;  %v605_v25 = vld [vmem:[#allocation8 + $0x30] ss:$8 sps:$4 sm:$0xff]   ;;  %v610_v26 = vld [vmem:[#allocation8 + $0x44] ss:$8 sps:$4 sm:$0xff]  }
  0x53   :  { %v608_v27 = vld [vmem:[#allocation8 + $0x40] ss:$8 sps:$4 sm:$0xff]   ;;  %v613_v28 = vld [vmem:[#allocation8 + $0x54] ss:$8 sps:$4 sm:$0xff]   ;;  %v611_v29 = vld [vmem:[#allocation8 + $0x50] ss:$8 sps:$4 sm:$0xff]  }
  0x54   :  { %v616_v30 = vld [vmem:[#allocation8 + $0x64] ss:$8 sps:$4 sm:$0xff]   ;;  %v614_v31 = vld [vmem:[#allocation8 + $0x60] ss:$8 sps:$4 sm:$0xff]   ;;  %v476_v32 = vld [vmem:[%s867_s2] ss:$0 sm:$0xff] }
  0x55   :  { %533 = vmatpush3.bf16.msra.mxu0 %v582_v3  ;;  %553 = vmatpush3.bf16.msra.mxu1 %v590_v8  ;;  %v619_v40 = vld [vmem:[#allocation8 + $0x74] ss:$8 sps:$4 sm:$0xff]   ;;  %v617_v41 = vld [vmem:[#allocation8 + $0x70] ss:$8 sps:$4 sm:$0xff]  }
  0x56   :  { %534 = vmatprep.subr.bf16.mxu0 %v746_v0  ;;  %554 = vmatprep.subr.bf16.mxu1 %v746_v0  ;;  %v485_v43 = vld [vmem:[%s869_s4] ss:$0 sm:$0xff]  ;;  %s465_s4 = sshll.u32 %s749_s30, 4  ;;  %s466_s4 = int_to_ptr.vmem [resolvable:$true] %s465_s4 }
  0x57   :  { %v324_v54 = vld [vmem:[%s871_s6] sm:$0x3]  ;;  %s708_s8 = scalar_lea.vmem %s466_s4, 256  ;;  %p713_p5 = scmp.lt.s32.totalorder %s466_s4, %s466_s4 }
  0x58   :  { %v329_v56 = vrot.slane %v324_v54, %v328_v53  ;;  %v333_v57 = vrot.slane %v324_v54, %v332_v55  ;;  %p709_p4 = scmp.ne.s32.totalorder %s466_s4, %s708_s8  ;;  %p714_p6 = scmp.lt.s32.totalorder %s708_s8, %s708_s8 }
  0x59   :  { %535 = vmatpush3.bf16.msra.mxu0 %v583_v5  ;;  %555 = vmatpush3.bf16.msra.mxu1 %v591_v10 }
  0x5a   :  { %536 = vmatprep.subr.bf16.mxu0 %v746_v0  ;;  %556 = vmatprep.subr.bf16.mxu1 %v746_v0  ;;  %p715_p7 = por %p714_p6, %p713_p5 }
  0x5c   :  { %p716_p8 = pnand %p715_p7, %p709_p4 }
  0x5d   :  { %537 = vmatpush3.bf16.msra.mxu0 %v584_v7  ;;  %557 = vmatpush3.bf16.msra.mxu1 %v592_v12 }
  0x5e   :  { %538 = vmatprep.subr.bf16.mxu0 %v746_v0  ;;  %558 = vmatprep.subr.bf16.mxu1 %v746_v0 }
  0x61   :  { %539 = vmatpush3.bf16.msra.mxu0 %v585_v9  ;;  %559 = vmatpush3.bf16.msra.mxu1 %v593_v14 }
  0x62   :  { %540 = vmatprep.subr.bf16.mxu0 %v746_v0  ;;  %560 = vmatprep.subr.bf16.mxu1 %v746_v0 }
  0x65   :  { %541 = vmatpush3.bf16.msra.mxu0 %v586_v11  ;;  %561 = vmatpush3.bf16.msra.mxu1 %v594_v16 }
  0x66   :  { %542 = vmatprep.subr.bf16.mxu0 %v746_v0  ;;  %562 = vmatprep.subr.bf16.mxu1 %v746_v0 }
  0x69   :  { %543 = vmatpush3.bf16.msra.mxu0 %v587_v13  ;;  %563 = vmatpush3.bf16.msra.mxu1 %v595_v17 }
  0x6a   :  { %416 = vmatprep.subr.bf16.mxu0 %v598_v19 }
  0x6c   :  { %545 = vmatmul.mubr.bf16.vlgmr.msra.gmra.mrb[0].mxu0 %v81_v15 }
  0x6d   :  { %417 = vmatpush1.bf16.msra.mxu0 %v596_v18  ;;  %448 = vmatprep.mubr.bf16.mxu0 %v748_v42 }
  0x6e   :  { %418 = vmatprep.subr.bf16.mxu0 %v601_v20 }
  0x71   :  { %419 = vmatpush1.bf16.msra.mxu0 %v599_v21 }
  0x72   :  { %420 = vmatprep.subr.bf16.mxu0 %v604_v22 }
  0x75   :  { %421 = vmatpush1.bf16.msra.mxu0 %v602_v23 }
  0x76   :  { %422 = vmatprep.subr.bf16.mxu0 %v607_v24 }
  0x79   :  { %423 = vmatpush1.bf16.msra.mxu0 %v605_v25 }
  0x7a   :  { %424 = vmatprep.subr.bf16.mxu0 %v610_v26 }
  0x7d   :  { %425 = vmatpush1.bf16.msra.mxu0 %v608_v27 }
  0x7e   :  { %426 = vmatprep.subr.bf16.mxu0 %v613_v28 }
  0x81   :  { %427 = vmatpush1.bf16.msra.mxu0 %v611_v29 }
  0x82   :  { %428 = vmatprep.subr.bf16.mxu0 %v616_v30 }
  0x85   :  { %429 = vmatpush1.bf16.msra.mxu0 %v614_v31 }
  0x86   :  { %430 = vmatprep.subr.bf16.mxu0 %v619_v40 }
  0x89   :  { %431 = vmatpush1.bf16.msra.mxu0 %v617_v41 }
 0x13f   :  { %v187_v33 = vpop.f32.mrb[0].mxu0 }
 0x140   :  { %v188_v34 = vadd.f32 %v476_v32, %v187_v33  ;;  %v546_v35 = vpop.f32.mrb[1].mxu0 }
 0x141   :  { %v190_v36 = vpop.f32.mrb[2].mxu0 }
 0x142   :  { %v193_v37 = vmax.f32 %v188_v34, 0.0  ;;  %v547_v38 = vpop.f32.mrb[3].mxu0 }
 0x144   :  { %v194_v39 = vpack.c.bf16 %v193_v37, %v193_v37 }
 0x146   :  { %565 = vmatmul.mubr.bf16.vlgmr.msra.gmra.mrb[0].mxu1 %v194_v39 }
 0x219   :  { %v300_v44 = vpop.f32.mrb[0].mxu1 }
 0x21a   :  { %v301_v45 = vadd.f32 %v485_v43, %v300_v44  ;;  %v566_v46 = vpop.f32.mrb[1].mxu1 }
 0x21b   :  { %v303_v47 = vpop.f32.mrb[2].mxu1 }
 0x21c   :  { %v306_v48 = vmax.f32 %v301_v45, 0.0  ;;  %v567_v49 = vpop.f32.mrb[3].mxu1 }
 0x21e   :  { %v307_v50 = vpack.c.bf16 %v306_v48, %v306_v48 }
 0x220   :  { %449 = vmatmul.mubr.bf16.vlgmr.msra.gmra.mrb[4].mxu0 %v307_v50 }
 0x2f3   :  { %v450_v58 = vpop.f32.mrb[4].mxu0 }
 0x2f4   :  { %v451_v59 = vadd.f32 %v450_v58, %v329_v56  ;;  %v452_v60 = vpop.f32.mrb[5].mxu0 }
 0x2f5   :  { %v453_v61 = vadd.f32 %v452_v60, %v333_v57  ;;  %v454_v62 = vpop.f32.mrb[6].mxu0 }
 0x2f6   :  { %457 = vst [vmem:[#allocation10] sm:$0xff] %v451_v59  ;;  %v455_v63 = vpop.f32.mrb[7].mxu0 }
 0x2f7   :  { %458 = vst [vmem:[#allocation10 + $0x8] sm:$0xff] %v453_v61 }
 0x2f8   :  { %719 = shalt.err (!%p716_p8)
}
 0x2f9   :  { %s720_s10 = scalar_lea.hbm %s872_s7, 256 }
 0x2fa   :  { %p721_p9 = scmp.ne.s32.totalorder %s872_s7, %s720_s10  ;;  %p724_p10 = scmp.lt.u32.totalorder %s720_s10, %s872_s7 }
 0x2fc   :  { %p726_p11 = pnand %p724_p10, %p721_p9 }
 0x2fe   :  { %729 = shalt.err (!%p726_p11)
}
 0x2ff   :  { %468 = dma.vmem_to_hbm [thread:$0]  %s466_s4, 256, %s872_s7, [#allocation4]  }
 0x300   :  { %736 = dma.done.wait [#allocation4], 256  }
 0x301   :  { %737 = vsyncadd [#allocation4], 4294967040 }
 0x302   :  { %472 = vsyncpa [#allocation3], 1 }
 0x303   :  { %473 = vsyncpa [#allocation6], 1 }
 0x304   :  { %474 = vsyncpa [#allocation9], 1 }
 0x305   :  { %475 = vsyncpa [#allocation4], 1 }

</bundles_post_ra>
